<compile_context>
chip_gen: v7x
topology: tpu7x:2x2x1
jax: 0.10.0
libtpu: 0.0.40
codegen_flags: <defaults>
</compile_context>

<pallas_src>
import functools

import jax
import jax.numpy as jnp
from jax.experimental import pallas as pl
from jax.experimental.pallas import tpu as pltpu


LRELU_SLOPE = 0.2
BN_EPS = 1e-5
_VMEM_BUDGET = 12 * 1024 * 1024      # conservative: fits v5e's 16 MiB scoped default
_VMEM_LIMIT = 32 * 1024 * 1024       # <= physical VMEM on every chip (64 MiB on v7x)


def _round_up(x, m):
    return (x + m - 1) // m * m


def _pick_tile_m(m_rows, k_pad, n_pad):
    """Largest M tile whose double-buffered working set fits the VMEM budget."""
    m8 = _round_up(max(m_rows, 8), 8)
    for t in (1024, 512, 256, 128, 64, 32, 16, 8):
        if t > m8:
            continue
        vmem = (2 * t * k_pad * 2        # cols, bf16, double buffered
                + k_pad * n_pad * 2      # weights, bf16, resident
                + 2 * t * n_pad * 4      # f32 output, double buffered
                + 2 * 2 * n_pad * 4)     # per-tile stats (BN layers)
        if vmem <= _VMEM_BUDGET:
            return t
    return 8


def _compiler_params():
    return pltpu.CompilerParams(
        dimension_semantics=("parallel",),
        vmem_limit_bytes=_VMEM_LIMIT)


# ----------------------------------------------------------------------------
# Pallas kernels
# ----------------------------------------------------------------------------
def _gemm_act_kernel(cols_ref, w_ref, out_ref, *, use_act):
    # (TILE_M, K_pad) bf16 @ (K_pad, N_pad) bf16 -> f32 on the MXU.
    y = jnp.dot(cols_ref[...], w_ref[...], preferred_element_type=jnp.float32)
    if use_act:
        y = jnp.where(y > 0, y, LRELU_SLOPE * y)   # LeakyReLU(0.2)
    out_ref[...] = y


def _gemm_stats_kernel(cols_ref, w_ref, y_ref, stats_ref):
    # GEMM pass for BN layers: also emit per-tile partial sum / sum-of-squares
    # so batch statistics can be formed over ALL M rows outside the kernel.
    y = jnp.dot(cols_ref[...], w_ref[...], preferred_element_type=jnp.float32)
    y_ref[...] = y
    s1 = jnp.sum(y, axis=0, keepdims=True)          # (1, N_pad)
    s2 = jnp.sum(y * y, axis=0, keepdims=True)      # (1, N_pad)
    stats_ref[...] = jnp.concatenate([s1, s2], axis=0)[None, :, :]


def _affine_act_kernel(y_ref, scale_ref, shift_ref, out_ref, *, use_act):
    # BN-apply (folded into per-channel affine) + LeakyReLU, all in f32.
    z = y_ref[...] * scale_ref[...] + shift_ref[...]
    if use_act:
        z = jnp.where(z > 0, z, LRELU_SLOPE * z)
    out_ref[...] = z


# ----------------------------------------------------------------------------
# pallas_call wrappers
# ----------------------------------------------------------------------------
def _gemm_pallas(cols_p, w_p, tile_m, with_stats, use_act):
    m_pad, k_pad = cols_p.shape
    n_pad = w_p.shape[1]
    n_tiles = m_pad // tile_m

    in_specs = [
        pl.BlockSpec((tile_m, k_pad), lambda i: (i, 0)),
        pl.BlockSpec((k_pad, n_pad), lambda i: (0, 0)),     # weights resident
    ]
    y_spec = pl.BlockSpec((tile_m, n_pad), lambda i: (i, 0))
    cost = pl.CostEstimate(
        flops=2 * m_pad * k_pad * n_pad,
        transcendentals=0,
        bytes_accessed=(m_pad * k_pad * 2 + k_pad * n_pad * 2
                        + m_pad * n_pad * 4))

    if with_stats:
        kernel = _gemm_stats_kernel
        out_shape = (jax.ShapeDtypeStruct((m_pad, n_pad), jnp.float32),
                     jax.ShapeDtypeStruct((n_tiles, 2, n_pad), jnp.float32))
        out_specs = (y_spec,
                     pl.BlockSpec((1, 2, n_pad), lambda i: (i, 0, 0)))
    else:
        kernel = functools.partial(_gemm_act_kernel, use_act=use_act)
        out_shape = jax.ShapeDtypeStruct((m_pad, n_pad), jnp.float32)
        out_specs = y_spec

    return pl.pallas_call(
        kernel,
        grid=(n_tiles,),
        in_specs=in_specs,
        out_specs=out_specs,
        out_shape=out_shape,
        compiler_params=_compiler_params(),
        cost_estimate=cost,
    )(cols_p, w_p)


def _affine_act_pallas(y_p, scale, shift, tile_m, use_act):
    m_pad, n_pad = y_p.shape
    n_tiles = m_pad // tile_m
    cost = pl.CostEstimate(
        flops=4 * m_pad * n_pad,
        transcendentals=0,
        bytes_accessed=2 * m_pad * n_pad * 4)
    return pl.pallas_call(
        functools.partial(_affine_act_kernel, use_act=use_act),
        grid=(n_tiles,),
        in_specs=[pl.BlockSpec((tile_m, n_pad), lambda i: (i, 0)),
                  pl.BlockSpec((1, n_pad), lambda i: (0, 0)),
                  pl.BlockSpec((1, n_pad), lambda i: (0, 0))],
        out_specs=pl.BlockSpec((tile_m, n_pad), lambda i: (i, 0)),
        out_shape=jax.ShapeDtypeStruct((m_pad, n_pad), jnp.float32),
        compiler_params=_compiler_params(),
        cost_estimate=cost,
    )(y_p, scale, shift)


# ----------------------------------------------------------------------------
# Glue: NHWC im2col and the fused conv + BN + LeakyReLU layer
# ----------------------------------------------------------------------------
def _im2col_nhwc(x, k, stride, pad):
    b, h, w, c = x.shape
    xp = jnp.pad(x, ((0, 0), (pad, pad), (pad, pad), (0, 0)))
    oh = (h + 2 * pad - k) // stride + 1
    ow = (w + 2 * pad - k) // stride + 1
    patches = []
    for kh in range(k):
        for kw in range(k):
            patches.append(
                xp[:, kh:kh + stride * oh:stride, kw:kw + stride * ow:stride, :])
    cols = jnp.concatenate(patches, axis=-1)   # feature order: (kh, kw, cin)
    return cols.reshape(b * oh * ow, k * k * c), oh, ow


def conv_layer_nhwc(x, w, stride, pad, gamma=None, beta=None,
                    use_bn=False, use_act=True):
    """x: (B,H,W,Cin) f32.  w: (Cout,Cin,K,K) PyTorch layout.  Returns NHWC f32."""
    b = x.shape[0]
    cout, cin, k, _ = w.shape
    cols, oh, ow = _im2col_nhwc(x, k, stride, pad)
    m, kdim = cols.shape

    k_pad = _round_up(kdim, 128)
    n_pad = _round_up(cout, 128)
    tile_m = _pick_tile_m(m, k_pad, n_pad)
    m_pad = _round_up(m, tile_m)

    # Zero-pad M/K/N; zero rows/columns leave the GEMM result unchanged.
    cols_p = jnp.zeros((m_pad, k_pad), jnp.bfloat16).at[:m, :kdim].set(
        cols.astype(jnp.bfloat16))
    w_t = w.transpose(2, 3, 1, 0).reshape(k * k * cin, cout)   # matches (kh,kw,cin)
    w_p = jnp.zeros((k_pad, n_pad), jnp.bfloat16).at[:kdim, :cout].set(
        w_t.astype(jnp.bfloat16))

    if use_bn:
        y_p, partial = _gemm_pallas(cols_p, w_p, tile_m, True, use_act)
        sums = jnp.sum(partial, axis=0)                      # (2, n_pad)
        mean = sums[0] / m                                   # true M, not m_pad
        var = jnp.maximum(sums[1] / m - mean * mean, 0.0)    # biased variance
        gamma_p = jnp.zeros((n_pad,), jnp.float32).at[:cout].set(
            gamma.astype(jnp.float32))
        beta_p = jnp.zeros((n_pad,), jnp.float32).at[:cout].set(
            beta.astype(jnp.float32))
        scale = gamma_p * jax.lax.rsqrt(var + BN_EPS)
        shift = beta_p - mean * scale
        out_p = _affine_act_pallas(y_p, scale[None, :], shift[None, :],
                                   tile_m, use_act)
    else:
        out_p = _gemm_pallas(cols_p, w_p, tile_m, False, use_act)

    return out_p[:m, :cout].reshape(b, oh, ow, cout)


# ----------------------------------------------------------------------------
# Encoder: parameter construction (deterministic) + forward
# ----------------------------------------------------------------------------
def init_encoder_params(key, image_size, nz, nc, ndf,
                        n_extra_layers=0, add_final_conv=True):
    assert image_size % 16 == 0, 'imageSize has to be a multiple of 16'
    keys = iter(jax.random.split(key, 128))

    def w_init(shape):
        return (0.02 * jax.random.normal(next(keys), shape)).astype(jnp.float32)

    layers = []
    # initial conv: nc -> ndf, 4x4 / stride 2 / pad 1, no bias, + LeakyReLU
    layers.append(dict(w=w_init((ndf, nc, 4, 4)), stride=2, pad=1,
                       use_bn=False, use_act=True, gamma=None, beta=None))
    csize, cndf = image_size // 2, ndf

    # extra layers: cndf -> cndf, 3x3 / stride 1 / pad 1, + BN + LeakyReLU
    for _ in range(n_extra_layers):
        layers.append(dict(
            w=w_init((cndf, cndf, 3, 3)), stride=1, pad=1,
            use_bn=True, use_act=True,
            gamma=(1.0 + 0.01 * jax.random.normal(next(keys), (cndf,))).astype(jnp.float32),
            beta=(0.01 * jax.random.normal(next(keys), (cndf,))).astype(jnp.float32)))

    # pyramid: cndf -> 2*cndf, 4x4 / stride 2 / pad 1, + BN + LeakyReLU
    while csize > 4:
        in_feat, out_feat = cndf, cndf * 2
        layers.append(dict(
            w=w_init((out_feat, in_feat, 4, 4)), stride=2, pad=1,
            use_bn=True, use_act=True,
            gamma=(1.0 + 0.01 * jax.random.normal(next(keys), (out_feat,))).astype(jnp.float32),
            beta=(0.01 * jax.random.normal(next(keys), (out_feat,))).astype(jnp.float32)))
        cndf, csize = out_feat, csize // 2

    # final conv: cndf -> nz, 4x4 / stride 1 / pad 0, no BN / no activation
    if add_final_conv:
        layers.append(dict(w=w_init((nz, cndf, 4, 4)), stride=1, pad=0,
                           use_bn=False, use_act=False, gamma=None, beta=None))
    return layers


def encoder_forward(layers, x_nchw):
    out = jnp.transpose(x_nchw, (0, 2, 3, 1))        # NCHW -> NHWC, once
    for lyr in layers:
        out = conv_layer_nhwc(out, lyr["w"], lyr["stride"], lyr["pad"],
                              gamma=lyr["gamma"], beta=lyr["beta"],
                              use_bn=lyr["use_bn"], use_act=lyr["use_act"])
    return jnp.transpose(out, (0, 3, 1, 2))          # NHWC -> NCHW at the boundary


# ----------------------------------------------------------------------------
if __name__ == "__main__":
    B, imageSize, nc, ndf, nz = 2, 16, 4, 8, 32
    n_extra_layers = 1

    key = jax.random.PRNGKey(0)
    kx, kp = jax.random.split(key)
    x = jax.random.normal(kx, (B, nc, imageSize, imageSize), jnp.float32)

    layers = init_encoder_params(kp, imageSize, nz, nc, ndf,
                                 n_extra_layers=n_extra_layers,
                                 add_final_conv=True)

    fwd = jax.jit(lambda inp: encoder_forward(layers, inp))
    out = fwd(x)
    jax.block_until_ready(out)

    assert out.shape == (B, nz, 1, 1), out.shape
    assert jnp.isfinite(out).all()
    print("KERNEL_OK")
</pallas_src>

<mosaic_0001>
module attributes {stable_mosaic.version = 11 : i64} {
  func.func @_gemm_act_kernel(%arg0: i32, %arg1: memref<128x128xbf16, #tpu.memory_space<vmem>>, %arg2: memref<128x128xbf16, #tpu.memory_space<vmem>>, %arg3: memref<128x128xf32, #tpu.memory_space<vmem>>) attributes {dimension_semantics = [#tpu.dimension_semantics<parallel>], iteration_bounds = array<i64: 1>, scalar_prefetch = 0 : i64, scratch_operands = 0 : i64, tpu.core_type = #tpu.core_type<tc>, window_params = [{transform_indices = @transform_0, window_bounds = array<i64: 128, 128>}, {pipeline_mode = #tpu.pipeline_mode<synchronous>, transform_indices = @transform_1, window_bounds = array<i64: 128, 128>}, {transform_indices = @transform_2, window_bounds = array<i64: 128, 128>}]} {
    %c0 = arith.constant 0 : index
    %c0_0 = arith.constant 0 : index
    %0 = vector.load %arg1[%c0, %c0_0] : memref<128x128xbf16, #tpu.memory_space<vmem>>, vector<128x128xbf16>
    %c0_1 = arith.constant 0 : index
    %c0_2 = arith.constant 0 : index
    %1 = vector.load %arg2[%c0_1, %c0_2] : memref<128x128xbf16, #tpu.memory_space<vmem>>, vector<128x128xbf16>
    %cst = arith.constant dense<0.000000e+00> : vector<128x128xf32>
    %2 = tpu.matmul %0, %1, %cst {dimension_numbers = #tpu.dot_dimension_numbers<[1], [0], [0], [1], [0, 0, 1, 1], [], []>} : vector<128x128xbf16>, vector<128x128xbf16>, vector<128x128xf32> -> vector<128x128xf32>
    %cst_3 = arith.constant 0.000000e+00 : f32
    %3 = vector.broadcast %cst_3 : f32 to vector<128x128xf32>
    %4 = arith.cmpf ogt, %2, %3 : vector<128x128xf32>
    %cst_4 = arith.constant 2.000000e-01 : f32
    %5 = vector.broadcast %cst_4 : f32 to vector<128x128xf32>
    %6 = arith.mulf %5, %2 : vector<128x128xf32>
    %7 = arith.select %4, %2, %6 : vector<128x128xi1>, vector<128x128xf32>
    %c0_5 = arith.constant 0 : index
    %c0_6 = arith.constant 0 : index
    %8 = vector.load %arg3[%c0_5, %c0_6] : memref<128x128xf32, #tpu.memory_space<vmem>>, vector<128x128xf32>
    tpu.vector_store %arg3[%c0_5, %c0_6], %7 {strides = array<i32>} : memref<128x128xf32, #tpu.memory_space<vmem>>, vector<128x128xf32>,
    return
  }
  func.func @transform_0(%arg0: i32) -> (i32, i32) {
    %c0_i32 = arith.constant 0 : i32
    %c0_i32_0 = arith.constant 0 : i32
    return %arg0, %c0_i32 : i32, i32
  }
  func.func @transform_1(%arg0: i32) -> (i32, i32) {
    %c0_i32 = arith.constant 0 : i32
    %c0_i32_0 = arith.constant 0 : i32
    %c0_i32_1 = arith.constant 0 : i32
    return %c0_i32, %c0_i32_0 : i32, i32
  }
  func.func @transform_2(%arg0: i32) -> (i32, i32) {
    %c0_i32 = arith.constant 0 : i32
    %c0_i32_0 = arith.constant 0 : i32
    return %arg0, %c0_i32 : i32, i32
  }
}

module attributes {stable_mosaic.version = 11 : i64} {
  func.func @_gemm_stats_kernel(%arg0: i32, %arg1: memref<128x128xbf16, #tpu.memory_space<vmem>>, %arg2: memref<128x128xbf16, #tpu.memory_space<vmem>>, %arg3: memref<128x128xf32, #tpu.memory_space<vmem>>, %arg4: memref<1x2x128xf32, #tpu.memory_space<vmem>>) attributes {dimension_semantics = [#tpu.dimension_semantics<parallel>], iteration_bounds = array<i64: 1>, scalar_prefetch = 0 : i64, scratch_operands = 0 : i64, tpu.core_type = #tpu.core_type<tc>, window_params = [{transform_indices = @transform_0, window_bounds = array<i64: 128, 128>}, {pipeline_mode = #tpu.pipeline_mode<synchronous>, transform_indices = @transform_1, window_bounds = array<i64: 128, 128>}, {transform_indices = @transform_2, window_bounds = array<i64: 128, 128>}, {transform_indices = @transform_3, window_bounds = array<i64: 1, 2, 128>}]} {
    %c0 = arith.constant 0 : index
    %c0_0 = arith.constant 0 : index
    %0 = vector.load %arg1[%c0, %c0_0] : memref<128x128xbf16, #tpu.memory_space<vmem>>, vector<128x128xbf16>
    %c0_1 = arith.constant 0 : index
    %c0_2 = arith.constant 0 : index
    %1 = vector.load %arg2[%c0_1, %c0_2] : memref<128x128xbf16, #tpu.memory_space<vmem>>, vector<128x128xbf16>
    %cst = arith.constant dense<0.000000e+00> : vector<128x128xf32>
    %2 = tpu.matmul %0, %1, %cst {dimension_numbers = #tpu.dot_dimension_numbers<[1], [0], [0], [1], [0, 0, 1, 1], [], []>} : vector<128x128xbf16>, vector<128x128xbf16>, vector<128x128xf32> -> vector<128x128xf32>
    %c0_3 = arith.constant 0 : index
    %c0_4 = arith.constant 0 : index
    %3 = vector.load %arg3[%c0_3, %c0_4] : memref<128x128xf32, #tpu.memory_space<vmem>>, vector<128x128xf32>
    tpu.vector_store %arg3[%c0_3, %c0_4], %2 {strides = array<i32>} : memref<128x128xf32, #tpu.memory_space<vmem>>, vector<128x128xf32>,
    %cst_5 = arith.constant dense<0.000000e+00> : vector<128xf32>
    %4 = vector.multi_reduction <add>, %2, %cst_5 [0] : vector<128x128xf32> to vector<128xf32>
    %5 = vector.shape_cast %4 : vector<128xf32> to vector<1x128xf32>
    %6 = arith.mulf %2, %2 : vector<128x128xf32>
    %cst_6 = arith.constant dense<0.000000e+00> : vector<128xf32>
    %7 = vector.multi_reduction <add>, %6, %cst_6 [0] : vector<128x128xf32> to vector<128xf32>
    %8 = vector.shape_cast %7 : vector<128xf32> to vector<1x128xf32>
    %9 = tpu.concatenate %5, %8 in 0 : vector<1x128xf32>, vector<1x128xf32> -> vector<2x128xf32>
    %10 = vector.shape_cast %9 : vector<2x128xf32> to vector<1x2x128xf32>
    %c0_7 = arith.constant 0 : index
    %c0_8 = arith.constant 0 : index
    %c0_9 = arith.constant 0 : index
    %11 = vector.load %arg4[%c0_7, %c0_8, %c0_9] : memref<1x2x128xf32, #tpu.memory_space<vmem>>, vector<1x2x128xf32>
    tpu.vector_store %arg4[%c0_7, %c0_8, %c0_9], %10 {strides = array<i32>} : memref<1x2x128xf32, #tpu.memory_space<vmem>>, vector<1x2x128xf32>,
    return
  }
  func.func @transform_0(%arg0: i32) -> (i32, i32) {
    %c0_i32 = arith.constant 0 : i32
    %c0_i32_0 = arith.constant 0 : i32
    return %arg0, %c0_i32 : i32, i32
  }
  func.func @transform_1(%arg0: i32) -> (i32, i32) {
    %c0_i32 = arith.constant 0 : i32
    %c0_i32_0 = arith.constant 0 : i32
    %c0_i32_1 = arith.constant 0 : i32
    return %c0_i32, %c0_i32_0 : i32, i32
  }
  func.func @transform_2(%arg0: i32) -> (i32, i32) {
    %c0_i32 = arith.constant 0 : i32
    %c0_i32_0 = arith.constant 0 : i32
    return %arg0, %c0_i32 : i32, i32
  }
  func.func @transform_3(%arg0: i32) -> (i32, i32, i32) {
    %c0_i32 = arith.constant 0 : i32
    %c0_i32_0 = arith.constant 0 : i32
    %c0_i32_1 = arith.constant 0 : i32
    return %arg0, %c0_i32, %c0_i32_0 : i32, i32, i32
  }
}

module attributes {stable_mosaic.version = 11 : i64} {
  func.func @_affine_act_kernel(%arg0: i32, %arg1: memref<128x128xf32, #tpu.memory_space<vmem>>, %arg2: memref<1x128xf32, #tpu.memory_space<vmem>>, %arg3: memref<1x128xf32, #tpu.memory_space<vmem>>, %arg4: memref<128x128xf32, #tpu.memory_space<vmem>>) attributes {dimension_semantics = [#tpu.dimension_semantics<parallel>], iteration_bounds = array<i64: 1>, scalar_prefetch = 0 : i64, scratch_operands = 0 : i64, tpu.core_type = #tpu.core_type<tc>, window_params = [{transform_indices = @transform_0, window_bounds = array<i64: 128, 128>}, {pipeline_mode = #tpu.pipeline_mode<synchronous>, transform_indices = @transform_1, window_bounds = array<i64: 1, 128>}, {pipeline_mode = #tpu.pipeline_mode<synchronous>, transform_indices = @transform_2, window_bounds = array<i64: 1, 128>}, {transform_indices = @transform_3, window_bounds = array<i64: 128, 128>}]} {
    %c0 = arith.constant 0 : index
    %c0_0 = arith.constant 0 : index
    %0 = vector.load %arg1[%c0, %c0_0] : memref<128x128xf32, #tpu.memory_space<vmem>>, vector<128x128xf32>
    %c0_1 = arith.constant 0 : index
    %c0_2 = arith.constant 0 : index
    %1 = vector.load %arg2[%c0_1, %c0_2] : memref<1x128xf32, #tpu.memory_space<vmem>>, vector<1x128xf32>
    %2 = vector.broadcast %1 : vector<1x128xf32> to vector<128x128xf32>
    %3 = arith.mulf %0, %2 : vector<128x128xf32>
    %c0_3 = arith.constant 0 : index
    %c0_4 = arith.constant 0 : index
    %4 = vector.load %arg3[%c0_3, %c0_4] : memref<1x128xf32, #tpu.memory_space<vmem>>, vector<1x128xf32>
    %5 = vector.broadcast %4 : vector<1x128xf32> to vector<128x128xf32>
    %6 = arith.addf %3, %5 : vector<128x128xf32>
    %cst = arith.constant 0.000000e+00 : f32
    %7 = vector.broadcast %cst : f32 to vector<128x128xf32>
    %8 = arith.cmpf ogt, %6, %7 : vector<128x128xf32>
    %cst_5 = arith.constant 2.000000e-01 : f32
    %9 = vector.broadcast %cst_5 : f32 to vector<128x128xf32>
    %10 = arith.mulf %9, %6 : vector<128x128xf32>
    %11 = arith.select %8, %6, %10 : vector<128x128xi1>, vector<128x128xf32>
    %c0_6 = arith.constant 0 : index
    %c0_7 = arith.constant 0 : index
    %12 = vector.load %arg4[%c0_6, %c0_7] : memref<128x128xf32, #tpu.memory_space<vmem>>, vector<128x128xf32>
    tpu.vector_store %arg4[%c0_6, %c0_7], %11 {strides = array<i32>} : memref<128x128xf32, #tpu.memory_space<vmem>>, vector<128x128xf32>,
    return
  }
  func.func @transform_0(%arg0: i32) -> (i32, i32) {
    %c0_i32 = arith.constant 0 : i32
    %c0_i32_0 = arith.constant 0 : i32
    return %arg0, %c0_i32 : i32, i32
  }
  func.func @transform_1(%arg0: i32) -> (i32, i32) {
    %c0_i32 = arith.constant 0 : i32
    %c0_i32_0 = arith.constant 0 : i32
    %c0_i32_1 = arith.constant 0 : i32
    return %c0_i32, %c0_i32_0 : i32, i32
  }
  func.func @transform_2(%arg0: i32) -> (i32, i32) {
    %c0_i32 = arith.constant 0 : i32
    %c0_i32_0 = arith.constant 0 : i32
    %c0_i32_1 = arith.constant 0 : i32
    return %c0_i32, %c0_i32_0 : i32, i32
  }
  func.func @transform_3(%arg0: i32) -> (i32, i32) {
    %c0_i32 = arith.constant 0 : i32
    %c0_i32_0 = arith.constant 0 : i32
    return %arg0, %c0_i32 : i32, i32
  }
}

module attributes {stable_mosaic.version = 11 : i64} {
  func.func @_gemm_stats_kernel(%arg0: i32, %arg1: memref<32x128xbf16, #tpu.memory_space<vmem>>, %arg2: memref<128x128xbf16, #tpu.memory_space<vmem>>, %arg3: memref<32x128xf32, #tpu.memory_space<vmem>>, %arg4: memref<1x2x128xf32, #tpu.memory_space<vmem>>) attributes {dimension_semantics = [#tpu.dimension_semantics<parallel>], iteration_bounds = array<i64: 1>, scalar_prefetch = 0 : i64, scratch_operands = 0 : i64, tpu.core_type = #tpu.core_type<tc>, window_params = [{transform_indices = @transform_0, window_bounds = array<i64: 32, 128>}, {pipeline_mode = #tpu.pipeline_mode<synchronous>, transform_indices = @transform_1, window_bounds = array<i64: 128, 128>}, {transform_indices = @transform_2, window_bounds = array<i64: 32, 128>}, {transform_indices = @transform_3, window_bounds = array<i64: 1, 2, 128>}]} {
    %c0 = arith.constant 0 : index
    %c0_0 = arith.constant 0 : index
    %0 = vector.load %arg1[%c0, %c0_0] : memref<32x128xbf16, #tpu.memory_space<vmem>>, vector<32x128xbf16>
    %c0_1 = arith.constant 0 : index
    %c0_2 = arith.constant 0 : index
    %1 = vector.load %arg2[%c0_1, %c0_2] : memref<128x128xbf16, #tpu.memory_space<vmem>>, vector<128x128xbf16>
    %cst = arith.constant dense<0.000000e+00> : vector<32x128xf32>
    %2 = tpu.matmul %0, %1, %cst {dimension_numbers = #tpu.dot_dimension_numbers<[1], [0], [0], [1], [0, 0, 1, 1], [], []>} : vector<32x128xbf16>, vector<128x128xbf16>, vector<32x128xf32> -> vector<32x128xf32>
    %c0_3 = arith.constant 0 : index
    %c0_4 = arith.constant 0 : index
    %3 = vector.load %arg3[%c0_3, %c0_4] : memref<32x128xf32, #tpu.memory_space<vmem>>, vector<32x128xf32>
    tpu.vector_store %arg3[%c0_3, %c0_4], %2 {strides = array<i32>} : memref<32x128xf32, #tpu.memory_space<vmem>>, vector<32x128xf32>,
    %cst_5 = arith.constant dense<0.000000e+00> : vector<128xf32>
    %4 = vector.multi_reduction <add>, %2, %cst_5 [0] : vector<32x128xf32> to vector<128xf32>
    %5 = vector.shape_cast %4 : vector<128xf32> to vector<1x128xf32>
    %6 = arith.mulf %2, %2 : vector<32x128xf32>
    %cst_6 = arith.constant dense<0.000000e+00> : vector<128xf32>
    %7 = vector.multi_reduction <add>, %6, %cst_6 [0] : vector<32x128xf32> to vector<128xf32>
    %8 = vector.shape_cast %7 : vector<128xf32> to vector<1x128xf32>
    %9 = tpu.concatenate %5, %8 in 0 : vector<1x128xf32>, vector<1x128xf32> -> vector<2x128xf32>
    %10 = vector.shape_cast %9 : vector<2x128xf32> to vector<1x2x128xf32>
    %c0_7 = arith.constant 0 : index
    %c0_8 = arith.constant 0 : index
    %c0_9 = arith.constant 0 : index
    %11 = vector.load %arg4[%c0_7, %c0_8, %c0_9] : memref<1x2x128xf32, #tpu.memory_space<vmem>>, vector<1x2x128xf32>
    tpu.vector_store %arg4[%c0_7, %c0_8, %c0_9], %10 {strides = array<i32>} : memref<1x2x128xf32, #tpu.memory_space<vmem>>, vector<1x2x128xf32>,
    return
  }
  func.func @transform_0(%arg0: i32) -> (i32, i32) {
    %c0_i32 = arith.constant 0 : i32
    %c0_i32_0 = arith.constant 0 : i32
    return %arg0, %c0_i32 : i32, i32
  }
  func.func @transform_1(%arg0: i32) -> (i32, i32) {
    %c0_i32 = arith.constant 0 : i32
    %c0_i32_0 = arith.constant 0 : i32
    %c0_i32_1 = arith.constant 0 : i32
    return %c0_i32, %c0_i32_0 : i32, i32
  }
  func.func @transform_2(%arg0: i32) -> (i32, i32) {
    %c0_i32 = arith.constant 0 : i32
    %c0_i32_0 = arith.constant 0 : i32
    return %arg0, %c0_i32 : i32, i32
  }
  func.func @transform_3(%arg0: i32) -> (i32, i32, i32) {
    %c0_i32 = arith.constant 0 : i32
    %c0_i32_0 = arith.constant 0 : i32
    %c0_i32_1 = arith.constant 0 : i32
    return %arg0, %c0_i32, %c0_i32_0 : i32, i32, i32
  }
}

module attributes {stable_mosaic.version = 11 : i64} {
  func.func @_affine_act_kernel(%arg0: i32, %arg1: memref<32x128xf32, #tpu.memory_space<vmem>>, %arg2: memref<1x128xf32, #tpu.memory_space<vmem>>, %arg3: memref<1x128xf32, #tpu.memory_space<vmem>>, %arg4: memref<32x128xf32, #tpu.memory_space<vmem>>) attributes {dimension_semantics = [#tpu.dimension_semantics<parallel>], iteration_bounds = array<i64: 1>, scalar_prefetch = 0 : i64, scratch_operands = 0 : i64, tpu.core_type = #tpu.core_type<tc>, window_params = [{transform_indices = @transform_0, window_bounds = array<i64: 32, 128>}, {pipeline_mode = #tpu.pipeline_mode<synchronous>, transform_indices = @transform_1, window_bounds = array<i64: 1, 128>}, {pipeline_mode = #tpu.pipeline_mode<synchronous>, transform_indices = @transform_2, window_bounds = array<i64: 1, 128>}, {transform_indices = @transform_3, window_bounds = array<i64: 32, 128>}]} {
    %c0 = arith.constant 0 : index
    %c0_0 = arith.constant 0 : index
    %0 = vector.load %arg1[%c0, %c0_0] : memref<32x128xf32, #tpu.memory_space<vmem>>, vector<32x128xf32>
    %c0_1 = arith.constant 0 : index
    %c0_2 = arith.constant 0 : index
    %1 = vector.load %arg2[%c0_1, %c0_2] : memref<1x128xf32, #tpu.memory_space<vmem>>, vector<1x128xf32>
    %2 = vector.broadcast %1 : vector<1x128xf32> to vector<32x128xf32>
    %3 = arith.mulf %0, %2 : vector<32x128xf32>
    %c0_3 = arith.constant 0 : index
    %c0_4 = arith.constant 0 : index
    %4 = vector.load %arg3[%c0_3, %c0_4] : memref<1x128xf32, #tpu.memory_space<vmem>>, vector<1x128xf32>
    %5 = vector.broadcast %4 : vector<1x128xf32> to vector<32x128xf32>
    %6 = arith.addf %3, %5 : vector<32x128xf32>
    %cst = arith.constant 0.000000e+00 : f32
    %7 = vector.broadcast %cst : f32 to vector<32x128xf32>
    %8 = arith.cmpf ogt, %6, %7 : vector<32x128xf32>
    %cst_5 = arith.constant 2.000000e-01 : f32
    %9 = vector.broadcast %cst_5 : f32 to vector<32x128xf32>
    %10 = arith.mulf %9, %6 : vector<32x128xf32>
    %11 = arith.select %8, %6, %10 : vector<32x128xi1>, vector<32x128xf32>
    %c0_6 = arith.constant 0 : index
    %c0_7 = arith.constant 0 : index
    %12 = vector.load %arg4[%c0_6, %c0_7] : memref<32x128xf32, #tpu.memory_space<vmem>>, vector<32x128xf32>
    tpu.vector_store %arg4[%c0_6, %c0_7], %11 {strides = array<i32>} : memref<32x128xf32, #tpu.memory_space<vmem>>, vector<32x128xf32>,
    return
  }
  func.func @transform_0(%arg0: i32) -> (i32, i32) {
    %c0_i32 = arith.constant 0 : i32
    %c0_i32_0 = arith.constant 0 : i32
    return %arg0, %c0_i32 : i32, i32
  }
  func.func @transform_1(%arg0: i32) -> (i32, i32) {
    %c0_i32 = arith.constant 0 : i32
    %c0_i32_0 = arith.constant 0 : i32
    %c0_i32_1 = arith.constant 0 : i32
    return %c0_i32, %c0_i32_0 : i32, i32
  }
  func.func @transform_2(%arg0: i32) -> (i32, i32) {
    %c0_i32 = arith.constant 0 : i32
    %c0_i32_0 = arith.constant 0 : i32
    %c0_i32_1 = arith.constant 0 : i32
    return %c0_i32, %c0_i32_0 : i32, i32
  }
  func.func @transform_3(%arg0: i32) -> (i32, i32) {
    %c0_i32 = arith.constant 0 : i32
    %c0_i32_0 = arith.constant 0 : i32
    return %arg0, %c0_i32 : i32, i32
  }
}

module attributes {stable_mosaic.version = 11 : i64} {
  func.func @_gemm_act_kernel(%arg0: i32, %arg1: memref<8x256xbf16, #tpu.memory_space<vmem>>, %arg2: memref<256x128xbf16, #tpu.memory_space<vmem>>, %arg3: memref<8x128xf32, #tpu.memory_space<vmem>>) attributes {dimension_semantics = [#tpu.dimension_semantics<parallel>], iteration_bounds = array<i64: 1>, scalar_prefetch = 0 : i64, scratch_operands = 0 : i64, tpu.core_type = #tpu.core_type<tc>, window_params = [{transform_indices = @transform_0, window_bounds = array<i64: 8, 256>}, {pipeline_mode = #tpu.pipeline_mode<synchronous>, transform_indices = @transform_1, window_bounds = array<i64: 256, 128>}, {transform_indices = @transform_2, window_bounds = array<i64: 8, 128>}]} {
    %c0 = arith.constant 0 : index
    %c0_0 = arith.constant 0 : index
    %0 = vector.load %arg1[%c0, %c0_0] : memref<8x256xbf16, #tpu.memory_space<vmem>>, vector<8x256xbf16>
    %c0_1 = arith.constant 0 : index
    %c0_2 = arith.constant 0 : index
    %1 = vector.load %arg2[%c0_1, %c0_2] : memref<256x128xbf16, #tpu.memory_space<vmem>>, vector<256x128xbf16>
    %cst = arith.constant dense<0.000000e+00> : vector<8x128xf32>
    %2 = tpu.matmul %0, %1, %cst {dimension_numbers = #tpu.dot_dimension_numbers<[1], [0], [0], [1], [0, 0, 1, 1], [], []>} : vector<8x256xbf16>, vector<256x128xbf16>, vector<8x128xf32> -> vector<8x128xf32>
    %c0_3 = arith.constant 0 : index
    %c0_4 = arith.constant 0 : index
    %3 = vector.load %arg3[%c0_3, %c0_4] : memref<8x128xf32, #tpu.memory_space<vmem>>, vector<8x128xf32>
    tpu.vector_store %arg3[%c0_3, %c0_4], %2 {strides = array<i32>} : memref<8x128xf32, #tpu.memory_space<vmem>>, vector<8x128xf32>,
    return
  }
  func.func @transform_0(%arg0: i32) -> (i32, i32) {
    %c0_i32 = arith.constant 0 : i32
    %c0_i32_0 = arith.constant 0 : i32
    return %arg0, %c0_i32 : i32, i32
  }
  func.func @transform_1(%arg0: i32) -> (i32, i32) {
    %c0_i32 = arith.constant 0 : i32
    %c0_i32_0 = arith.constant 0 : i32
    %c0_i32_1 = arith.constant 0 : i32
    return %c0_i32, %c0_i32_0 : i32, i32
  }
  func.func @transform_2(%arg0: i32) -> (i32, i32) {
    %c0_i32 = arith.constant 0 : i32
    %c0_i32_0 = arith.constant 0 : i32
    return %arg0, %c0_i32 : i32, i32
  }
}

</mosaic_0001>

<bundles_post_ra>
// kernel: _lambda_.6
= control target key start
LH: loop header
LB: loop body
LE: loop exit
PB: predicated region body
PF: predicated region fallthrough
CT: control target
= control target key end

     0   :  { %s512_s1 = inlined_call_operand.vmem [shape: bf16[128,128], index: 1, kind: input, shape index: {}]   ;;  %s513_s0 = inlined_call_operand.vmem [shape: bf16[128,128], index: 0, kind: input, shape index: {}]   ;;  %s514_s2 = inlined_call_operand.vmem [shape: f32[128,128], index: 2, kind: output, shape index: {}]  }
   0x1   :  { %v385_v0 = vld [vmem:[%s512_s1] sm:$0xff]   ;;  %v386_v1 = vld [vmem:[%s512_s1 + $0x8] sm:$0xff]   ;;  %v387_v2 = vld [vmem:[%s512_s1 + $0x10] sm:$0xff]  }
   0x2   :  { %337 = vmatprep.subr.bf16.mxu0 %v385_v0  ;;  %369 = vmatprep.subr.bf16.mxu1 %v385_v0  ;;  %v388_v3 = vld [vmem:[%s512_s1 + $0x18] sm:$0xff]   ;;  %v393_v4 = vld [vmem:[%s513_s0] sm:$0xff]   ;;  %v390_v7 = vld [vmem:[%s512_s1 + $0x28] sm:$0xff]  }
   0x3   :  { %338 = vmatpush3.bf16.msra.mxu0 %v385_v0  ;;  %377 = vmatpush3.bf16.msra.mxu1 %v385_v0  ;;  %v394_v5 = vld [vmem:[%s513_s0 + $0x20] sm:$0xff]   ;;  %v391_v8 = vld [vmem:[%s512_s1 + $0x30] sm:$0xff]   ;;  %v392_v9 = vld [vmem:[%s512_s1 + $0x38] sm:$0xff]  }
   0x4   :  { %339 = vmatprep.subr.bf16.mxu0 %v386_v1  ;;  %370 = vmatprep.subr.bf16.mxu1 %v386_v1  ;;  %v389_v6 = vld [vmem:[%s512_s1 + $0x20] sm:$0xff]   ;;  %v395_v10 = vld [vmem:[%s513_s0 + $0x8] sm:$0xff]   ;;  %v397_v12 = vld [vmem:[%s513_s0 + $0x10] sm:$0xff]  }
   0x5   :  { %353 = vmatprep.mubr.bf16.mxu0 %v393_v4  ;;  %361 = vmatprep.mubr.bf16.mxu1 %v394_v5  ;;  %v396_v11 = vld [vmem:[%s513_s0 + $0x28] sm:$0xff]   ;;  %v398_v13 = vld [vmem:[%s513_s0 + $0x30] sm:$0xff]   ;;  %v399_v14 = vld [vmem:[%s513_s0 + $0x18] sm:$0xff]  }
   0x6   :  { %v400_v15 = vld [vmem:[%s513_s0 + $0x38] sm:$0xff]  }
   0x7   :  { %340 = vmatpush3.bf16.msra.mxu0 %v386_v1  ;;  %378 = vmatpush3.bf16.msra.mxu1 %v386_v1 }
   0x8   :  { %341 = vmatprep.subr.bf16.mxu0 %v387_v2  ;;  %371 = vmatprep.subr.bf16.mxu1 %v387_v2 }
   0xb   :  { %342 = vmatpush3.bf16.msra.mxu0 %v387_v2  ;;  %379 = vmatpush3.bf16.msra.mxu1 %v387_v2 }
   0xc   :  { %343 = vmatprep.subr.bf16.mxu0 %v388_v3  ;;  %372 = vmatprep.subr.bf16.mxu1 %v388_v3 }
   0xf   :  { %344 = vmatpush3.bf16.msra.mxu0 %v388_v3  ;;  %380 = vmatpush3.bf16.msra.mxu1 %v388_v3 }
  0x10   :  { %345 = vmatprep.subr.bf16.mxu0 %v389_v6  ;;  %373 = vmatprep.subr.bf16.mxu1 %v389_v6 }
  0x13   :  { %346 = vmatpush3.bf16.msra.mxu0 %v389_v6  ;;  %381 = vmatpush3.bf16.msra.mxu1 %v389_v6 }
  0x14   :  { %347 = vmatprep.subr.bf16.mxu0 %v390_v7  ;;  %374 = vmatprep.subr.bf16.mxu1 %v390_v7 }
  0x17   :  { %348 = vmatpush3.bf16.msra.mxu0 %v390_v7  ;;  %382 = vmatpush3.bf16.msra.mxu1 %v390_v7 }
  0x18   :  { %349 = vmatprep.subr.bf16.mxu0 %v391_v8  ;;  %375 = vmatprep.subr.bf16.mxu1 %v391_v8 }
  0x1b   :  { %350 = vmatpush3.bf16.msra.mxu0 %v391_v8  ;;  %383 = vmatpush3.bf16.msra.mxu1 %v391_v8 }
  0x1c   :  { %351 = vmatprep.subr.bf16.mxu0 %v392_v9  ;;  %376 = vmatprep.subr.bf16.mxu1 %v392_v9 }
  0x1f   :  { %352 = vmatpush3.bf16.msra.mxu0 %v392_v9  ;;  %384 = vmatpush3.bf16.msra.mxu1 %v392_v9 }
  0x22   :  { %354 = vmatmul.mubr.bf16.vlgmr.msra.gmra.mrb[0].mxu0 %v395_v10  ;;  %362 = vmatmul.mubr.bf16.vlgmr.msra.gmra.mrb[0].mxu1 %v396_v11 }
  0x23   :  { %357 = vmatprep.mubr.bf16.mxu0 %v397_v12  ;;  %365 = vmatprep.mubr.bf16.mxu1 %v398_v13 }
  0x2a   :  { %358 = vmatmul.mubr.bf16.gmra.mrb[4].mxu0 %v399_v14  ;;  %366 = vmatmul.mubr.bf16.gmra.mrb[4].mxu1 %v400_v15 }
  0xf5   :  { %v355_v16 = vpop.f32.mrb[0].mxu0  ;;  %v363_v17 = vpop.f32.mrb[0].mxu1 }
  0xf6   :  { %vm239_vm0 = vcmp.gt.f32.partialorder %v355_v16, 0.0  ;;  %v255_v18 = vmul.f32 0.2, %v355_v16  ;;  %vm247_vm1 = vcmp.gt.f32.partialorder %v363_v17, 0.0  ;;  %v263_v19 = vmul.f32 0.2, %v363_v17 }
  0xf7   :  { %v174_v20 = vpop.f32.mrb[1].mxu0  ;;  %v206_v21 = vpop.f32.mrb[1].mxu1 }
  0xf8   :  { %v271_v22 = vsel %vm239_vm0, %v355_v16, %v255_v18  ;;  %v279_v23 = vsel %vm247_vm1, %v363_v17, %v263_v19  ;;  %vm237_vm2 = vcmp.gt.f32.partialorder %v174_v20, 0.0  ;;  %v253_v24 = vmul.f32 0.2, %v174_v20  ;;  %v356_v25 = vpop.f32.mrb[2].mxu0  ;;  %v364_v26 = vpop.f32.mrb[2].mxu1 }
  0xf9   :  { %287 = vst [vmem:[%s514_s2 + $0x10] sm:$0xff] %v271_v22  ;;  %295 = vst [vmem:[%s514_s2 + $0x50] sm:$0xff] %v279_v23  ;;  %vm245_vm3 = vcmp.gt.f32.partialorder %v206_v21, 0.0  ;;  %v261_v27 = vmul.f32 0.2, %v206_v21  ;;  %vm240_vm4 = vcmp.gt.f32.partialorder %v356_v25, 0.0 }
  0xfa   :  { %v256_v28 = vmul.f32 0.2, %v356_v25  ;;  %v269_v29 = vsel %vm237_vm2, %v174_v20, %v253_v24  ;;  %vm248_vm5 = vcmp.gt.f32.partialorder %v364_v26, 0.0  ;;  %v264_v30 = vmul.f32 0.2, %v364_v26  ;;  %v177_v31 = vpop.f32.mrb[3].mxu0 }
  0xfb   :  { %v209_v32 = vpop.f32.mrb[3].mxu1  ;;  %285 = vst [vmem:[%s514_s2] sm:$0xff] %v269_v29  ;;  %v277_v33 = vsel %vm245_vm3, %v206_v21, %v261_v27  ;;  %vm238_vm6 = vcmp.gt.f32.partialorder %v177_v31, 0.0  ;;  %v254_v35 = vmul.f32 0.2, %v177_v31 }
  0xfc   :  { %v272_v34 = vsel %vm240_vm4, %v356_v25, %v256_v28  ;;  %293 = vst [vmem:[%s514_s2 + $0x40] sm:$0xff] %v277_v33  ;;  %v280_v36 = vsel %vm248_vm5, %v364_v26, %v264_v30  ;;  %vm246_vm7 = vcmp.gt.f32.partialorder %v209_v32, 0.0  ;;  %v262_v37 = vmul.f32 0.2, %v209_v32 }
  0xfd   :  { %288 = vst [vmem:[%s514_s2 + $0x18] sm:$0xff] %v272_v34  ;;  %296 = vst [vmem:[%s514_s2 + $0x58] sm:$0xff] %v280_v36  ;;  %v270_v38 = vsel %vm238_vm6, %v177_v31, %v254_v35  ;;  %v359_v39 = vpop.f32.mrb[4].mxu0  ;;  %v367_v40 = vpop.f32.mrb[4].mxu1 }
  0xfe   :  { %286 = vst [vmem:[%s514_s2 + $0x8] sm:$0xff] %v270_v38  ;;  %v278_v41 = vsel %vm246_vm7, %v209_v32, %v262_v37  ;;  %vm243_vm8 = vcmp.gt.f32.partialorder %v359_v39, 0.0  ;;  %v259_v42 = vmul.f32 0.2, %v359_v39  ;;  %vm251_vm9 = vcmp.gt.f32.partialorder %v367_v40, 0.0  ;;  %v190_v43 = vpop.f32.mrb[5].mxu0 }
  0xff   :  { %v222_v44 = vpop.f32.mrb[5].mxu1  ;;  %294 = vst [vmem:[%s514_s2 + $0x48] sm:$0xff] %v278_v41  ;;  %v267_v45 = vmul.f32 0.2, %v367_v40  ;;  %vm241_vm10 = vcmp.gt.f32.partialorder %v190_v43, 0.0  ;;  %v360_v49 = vpop.f32.mrb[6].mxu0 }
 0x100   :  { %v257_v46 = vmul.f32 0.2, %v190_v43  ;;  %vm249_vm11 = vcmp.gt.f32.partialorder %v222_v44, 0.0  ;;  %v275_v47 = vsel %vm243_vm8, %v359_v39, %v259_v42  ;;  %v265_v48 = vmul.f32 0.2, %v222_v44  ;;  %v368_v50 = vpop.f32.mrb[6].mxu1 }
 0x101   :  { %291 = vst [vmem:[%s514_s2 + $0x30] sm:$0xff] %v275_v47  ;;  %v283_v51 = vsel %vm251_vm9, %v367_v40, %v267_v45  ;;  %vm244_vm12 = vcmp.gt.f32.partialorder %v360_v49, 0.0  ;;  %v260_v53 = vmul.f32 0.2, %v360_v49  ;;  %v193_v54 = vpop.f32.mrb[7].mxu0  ;;  %v225_v55 = vpop.f32.mrb[7].mxu1 }
 0x102   :  { %v273_v52 = vsel %vm241_vm10, %v190_v43, %v257_v46  ;;  %299 = vst [vmem:[%s514_s2 + $0x70] sm:$0xff] %v283_v51  ;;  %v281_v56 = vsel %vm249_vm11, %v222_v44, %v265_v48  ;;  %vm252_vm13 = vcmp.gt.f32.partialorder %v368_v50, 0.0  ;;  %v268_v57 = vmul.f32 0.2, %v368_v50 }
 0x103   :  { %289 = vst [vmem:[%s514_s2 + $0x20] sm:$0xff] %v273_v52  ;;  %vm242_vm14 = vcmp.gt.f32.partialorder %v193_v54, 0.0  ;;  %297 = vst [vmem:[%s514_s2 + $0x60] sm:$0xff] %v281_v56  ;;  %v276_v58 = vsel %vm244_vm12, %v360_v49, %v260_v53  ;;  %v258_v59 = vmul.f32 0.2, %v193_v54  ;;  %vm250_vm15 = vcmp.gt.f32.partialorder %v225_v55, 0.0 }
 0x104   :  { %v266_v60 = vmul.f32 0.2, %v225_v55  ;;  %292 = vst [vmem:[%s514_s2 + $0x38] sm:$0xff] %v276_v58  ;;  %v284_v61 = vsel %vm252_vm13, %v368_v50, %v268_v57 }
 0x105   :  { %300 = vst [vmem:[%s514_s2 + $0x78] sm:$0xff] %v284_v61  ;;  %v274_v62 = vsel %vm242_vm14, %v193_v54, %v258_v59 }
 0x106   :  { %v282_v63 = vsel %vm250_vm15, %v225_v55, %v266_v60  ;;  %290 = vst [vmem:[%s514_s2 + $0x28] sm:$0xff] %v274_v62 }
 0x107   :  { %298 = vst [vmem:[%s514_s2 + $0x68] sm:$0xff] %v282_v63 }

// kernel: _lambda_.7
= control target key start
LH: loop header
LB: loop body
LE: loop exit
PB: predicated region body
PF: predicated region fallthrough
CT: control target
= control target key end

     0   :  { %vm313_vm0 = vcmask 1040384   ;;  %s539_s1 = inlined_call_operand.vmem [shape: bf16[128,128], index: 1, kind: input, shape index: {}]   ;;  %s540_s0 = inlined_call_operand.vmem [shape: bf16[128,128], index: 0, kind: input, shape index: {}]   ;;  %s541_s2 = inlined_call_operand.vmem [shape: f32[128,128], index: 2, kind: output, shape index: {0}]   ;;  %s542_s3 = inlined_call_operand.vmem [shape: f32[1,2,128], index: 3, kind: output, shape index: {1}]  }
   0x1   :  { %v404_v0 = vld [vmem:[%s539_s1] sm:$0xff]   ;;  %v405_v1 = vld [vmem:[%s539_s1 + $0x8] sm:$0xff]   ;;  %v406_v2 = vld [vmem:[%s539_s1 + $0x10] sm:$0xff]  }
   0x2   :  { %356 = vmatprep.subr.bf16.mxu0 %v404_v0  ;;  %388 = vmatprep.subr.bf16.mxu1 %v404_v0  ;;  %v407_v3 = vld [vmem:[%s539_s1 + $0x18] sm:$0xff]   ;;  %v412_v4 = vld [vmem:[%s540_s0] sm:$0xff]   ;;  %v409_v7 = vld [vmem:[%s539_s1 + $0x28] sm:$0xff]  }
   0x3   :  { %357 = vmatpush3.bf16.msra.mxu0 %v404_v0  ;;  %396 = vmatpush3.bf16.msra.mxu1 %v404_v0  ;;  %v408_v5 = vld [vmem:[%s539_s1 + $0x20] sm:$0xff]   ;;  %v410_v8 = vld [vmem:[%s539_s1 + $0x30] sm:$0xff]   ;;  %v411_v9 = vld [vmem:[%s539_s1 + $0x38] sm:$0xff]  }
   0x4   :  { %358 = vmatprep.subr.bf16.mxu0 %v405_v1  ;;  %389 = vmatprep.subr.bf16.mxu1 %v405_v1  ;;  %v416_v6 = vld [vmem:[%s540_s0 + $0x20] sm:$0xff]   ;;  %v413_v10 = vld [vmem:[%s540_s0 + $0x8] sm:$0xff]   ;;  %v414_v12 = vld [vmem:[%s540_s0 + $0x10] sm:$0xff]  }
   0x5   :  { %372 = vmatprep.mubr.bf16.mxu0 %v412_v4  ;;  %380 = vmatprep.mubr.bf16.mxu1 %v416_v6  ;;  %v417_v11 = vld [vmem:[%s540_s0 + $0x28] sm:$0xff]   ;;  %v418_v13 = vld [vmem:[%s540_s0 + $0x30] sm:$0xff]   ;;  %v415_v14 = vld [vmem:[%s540_s0 + $0x18] sm:$0xff]  }
   0x6   :  { %v419_v15 = vld [vmem:[%s540_s0 + $0x38] sm:$0xff]  }
   0x7   :  { %359 = vmatpush3.bf16.msra.mxu0 %v405_v1  ;;  %397 = vmatpush3.bf16.msra.mxu1 %v405_v1 }
   0x8   :  { %360 = vmatprep.subr.bf16.mxu0 %v406_v2  ;;  %390 = vmatprep.subr.bf16.mxu1 %v406_v2 }
   0xb   :  { %361 = vmatpush3.bf16.msra.mxu0 %v406_v2  ;;  %398 = vmatpush3.bf16.msra.mxu1 %v406_v2 }
   0xc   :  { %362 = vmatprep.subr.bf16.mxu0 %v407_v3  ;;  %391 = vmatprep.subr.bf16.mxu1 %v407_v3 }
   0xf   :  { %363 = vmatpush3.bf16.msra.mxu0 %v407_v3  ;;  %399 = vmatpush3.bf16.msra.mxu1 %v407_v3 }
  0x10   :  { %364 = vmatprep.subr.bf16.mxu0 %v408_v5  ;;  %392 = vmatprep.subr.bf16.mxu1 %v408_v5 }
  0x13   :  { %365 = vmatpush3.bf16.msra.mxu0 %v408_v5  ;;  %400 = vmatpush3.bf16.msra.mxu1 %v408_v5 }
  0x14   :  { %366 = vmatprep.subr.bf16.mxu0 %v409_v7  ;;  %393 = vmatprep.subr.bf16.mxu1 %v409_v7 }
  0x17   :  { %367 = vmatpush3.bf16.msra.mxu0 %v409_v7  ;;  %401 = vmatpush3.bf16.msra.mxu1 %v409_v7 }
  0x18   :  { %368 = vmatprep.subr.bf16.mxu0 %v410_v8  ;;  %394 = vmatprep.subr.bf16.mxu1 %v410_v8 }
  0x1b   :  { %369 = vmatpush3.bf16.msra.mxu0 %v410_v8  ;;  %402 = vmatpush3.bf16.msra.mxu1 %v410_v8 }
  0x1c   :  { %370 = vmatprep.subr.bf16.mxu0 %v411_v9  ;;  %395 = vmatprep.subr.bf16.mxu1 %v411_v9 }
  0x1f   :  { %371 = vmatpush3.bf16.msra.mxu0 %v411_v9  ;;  %403 = vmatpush3.bf16.msra.mxu1 %v411_v9 }
  0x22   :  { %373 = vmatmul.mubr.bf16.vlgmr.msra.gmra.mrb[0].mxu0 %v413_v10  ;;  %381 = vmatmul.mubr.bf16.vlgmr.msra.gmra.mrb[0].mxu1 %v417_v11 }
  0x23   :  { %376 = vmatprep.mubr.bf16.mxu0 %v414_v12  ;;  %384 = vmatprep.mubr.bf16.mxu1 %v418_v13 }
  0x2a   :  { %377 = vmatmul.mubr.bf16.gmra.mrb[4].mxu0 %v415_v14  ;;  %385 = vmatmul.mubr.bf16.gmra.mrb[4].mxu1 %v419_v15 }
  0xf5   :  { %v374_v16 = vpop.f32.mrb[0].mxu0  ;;  %v382_v17 = vpop.f32.mrb[0].mxu1 }
  0xf6   :  { %241 = vst [vmem:[%s541_s2 + $0x10] sm:$0xff] %v374_v16  ;;  %v176_v18 = vpop.f32.mrb[1].mxu0  ;;  %249 = vst [vmem:[%s541_s2 + $0x50] sm:$0xff] %v382_v17  ;;  %v208_v19 = vpop.f32.mrb[1].mxu1  ;;  %v278_v27 = vmul.f32 %v374_v16, %v374_v16  ;;  %v286_v59 = vmul.f32 %v382_v17, %v382_v17 }
  0xf7   :  { %239 = vst [vmem:[%s541_s2] sm:$0xff] %v176_v18  ;;  %v375_v20 = vpop.f32.mrb[2].mxu0  ;;  %247 = vst [vmem:[%s541_s2 + $0x40] sm:$0xff] %v208_v19  ;;  %v383_v21 = vpop.f32.mrb[2].mxu1  ;;  %v276_v24 = vmul.f32 %v176_v18, %v176_v18  ;;  %v284_v53 = vmul.f32 %v208_v19, %v208_v19 }
  0xf8   :  { %242 = vst [vmem:[%s541_s2 + $0x18] sm:$0xff] %v375_v20  ;;  %v179_v22 = vpop.f32.mrb[3].mxu0  ;;  %250 = vst [vmem:[%s541_s2 + $0x58] sm:$0xff] %v383_v21  ;;  %v211_v23 = vpop.f32.mrb[3].mxu1  ;;  %v279_v30 = vmul.f32 %v375_v20, %v375_v20  ;;  %v287_v62 = vmul.f32 %v383_v21, %v383_v21 }
  0xf9   :  { %240 = vst [vmem:[%s541_s2 + $0x8] sm:$0xff] %v179_v22  ;;  %v255_v25 = vadd.f32 %v179_v22, %v176_v18  ;;  %v277_v26 = vmul.f32 %v179_v22, %v179_v22  ;;  %248 = vst [vmem:[%s541_s2 + $0x48] sm:$0xff] %v211_v23  ;;  %v285_v58 = vmul.f32 %v211_v23, %v211_v23 }
  0xfb   :  { %v256_v28 = vadd.f32 %v374_v16, %v255_v25  ;;  %v292_v29 = vadd.f32 %v277_v26, %v276_v24 }
  0xfd   :  { %v293_v31 = vadd.f32 %v292_v29, %v278_v27  ;;  %v378_v32 = vpop.f32.mrb[4].mxu0  ;;  %v257_v33 = vadd.f32 %v375_v20, %v256_v28  ;;  %v386_v34 = vpop.f32.mrb[4].mxu1 }
  0xfe   :  { %245 = vst [vmem:[%s541_s2 + $0x30] sm:$0xff] %v378_v32  ;;  %v192_v35 = vpop.f32.mrb[5].mxu0  ;;  %253 = vst [vmem:[%s541_s2 + $0x70] sm:$0xff] %v386_v34  ;;  %v224_v36 = vpop.f32.mrb[5].mxu1  ;;  %v282_v47 = vmul.f32 %v378_v32, %v378_v32  ;;  %v290_v7 = vmul.f32 %v386_v34, %v386_v34 }
  0xff   :  { %243 = vst [vmem:[%s541_s2 + $0x20] sm:$0xff] %v192_v35  ;;  %v258_v37 = vadd.f32 %v257_v33, %v192_v35  ;;  %v280_v38 = vmul.f32 %v192_v35, %v192_v35  ;;  %v294_v39 = vadd.f32 %v293_v31, %v279_v30  ;;  %v379_v40 = vpop.f32.mrb[6].mxu0  ;;  %251 = vst [vmem:[%s541_s2 + $0x60] sm:$0xff] %v224_v36  ;;  %v387_v41 = vpop.f32.mrb[6].mxu1 }
 0x100   :  { %246 = vst [vmem:[%s541_s2 + $0x38] sm:$0xff] %v379_v40  ;;  %v195_v42 = vpop.f32.mrb[7].mxu0  ;;  %254 = vst [vmem:[%s541_s2 + $0x78] sm:$0xff] %v387_v41  ;;  %v227_v43 = vpop.f32.mrb[7].mxu1  ;;  %v283_v50 = vmul.f32 %v379_v40, %v379_v40  ;;  %v288_v1 = vmul.f32 %v224_v36, %v224_v36  ;;  %v291_v10 = vmul.f32 %v387_v41, %v387_v41 }
 0x101   :  { %v295_v44 = vadd.f32 %v294_v39, %v280_v38  ;;  %244 = vst [vmem:[%s541_s2 + $0x28] sm:$0xff] %v195_v42  ;;  %v259_v45 = vadd.f32 %v258_v37, %v195_v42  ;;  %v281_v46 = vmul.f32 %v195_v42, %v195_v42  ;;  %252 = vst [vmem:[%s541_s2 + $0x68] sm:$0xff] %v227_v43 }
 0x102   :  { %v289_v6 = vmul.f32 %v227_v43, %v227_v43 }
 0x103   :  { %v260_v48 = vadd.f32 %v378_v32, %v259_v45  ;;  %v296_v49 = vadd.f32 %v295_v44, %v281_v46 }
 0x105   :  { %v297_v51 = vadd.f32 %v296_v49, %v282_v47  ;;  %v261_v52 = vadd.f32 %v379_v40, %v260_v48 }
 0x107   :  { %v262_v54 = vadd.f32 %v261_v52, %v208_v19  ;;  %v298_v55 = vadd.f32 %v297_v51, %v283_v50 }
 0x109   :  { %v299_v56 = vadd.f32 %v298_v55, %v284_v53  ;;  %v263_v57 = vadd.f32 %v262_v54, %v211_v23 }
 0x10b   :  { %v264_v60 = vadd.f32 %v382_v17, %v263_v57  ;;  %v300_v61 = vadd.f32 %v299_v56, %v285_v58 }
 0x10d   :  { %v301_v63 = vadd.f32 %v300_v61, %v286_v59  ;;  %v265_v0 = vadd.f32 %v383_v21, %v264_v60 }
 0x10f   :  { %v266_v2 = vadd.f32 %v265_v0, %v224_v36  ;;  %v302_v3 = vadd.f32 %v301_v63, %v287_v62 }
 0x111   :  { %v303_v4 = vadd.f32 %v302_v3, %v288_v1  ;;  %v267_v5 = vadd.f32 %v266_v2, %v227_v43 }
 0x113   :  { %v268_v8 = vadd.f32 %v386_v34, %v267_v5  ;;  %v304_v9 = vadd.f32 %v303_v4, %v289_v6 }
 0x115   :  { %v269_v11 = vadd.f32 %v387_v41, %v268_v8  ;;  %v305_v12 = vadd.f32 %v304_v9, %v290_v7 }
 0x117   :  { %v270_v13 = vrot.slane %v269_v11, 4  ;;  %v306_v14 = vadd.f32 %v305_v12, %v291_v10 }
 0x119   :  { %v271_v15 = vadd.f32 %v270_v13, %v269_v11  ;;  %v307_v16 = vrot.slane %v306_v14, 4 }
 0x11b   :  { %v272_v17 = vrot.slane %v271_v15, 2  ;;  %v308_v18 = vadd.f32 %v307_v16, %v306_v14 }
 0x11d   :  { %v273_v19 = vadd.f32 %v272_v17, %v271_v15  ;;  %v309_v20 = vrot.slane %v308_v18, 2 }
 0x11f   :  { %v274_v21 = vrot.slane %v273_v19, 1  ;;  %v310_v22 = vadd.f32 %v309_v20, %v308_v18 }
 0x121   :  { %v311_v23 = vrot.slane %v310_v22, 1  ;;  %v275_v24 = vadd.f32 %v274_v21, %v273_v19 }
 0x123   :  { %v312_v25 = vadd.f32 %v311_v23, %v310_v22 }
 0x125   :  { %v314_v26 = vsel %vm313_vm0, %v275_v24, %v312_v25 }
 0x126   :  { %315 = vst [vmem:[%s542_s3] sm:$0x3] %v314_v26 }

// kernel: _lambda_.8
= control target key start
LH: loop header
LB: loop body
LE: loop exit
PB: predicated region body
PF: predicated region fallthrough
CT: control target
= control target key end

     0   :  { %s305_s0 = inlined_call_operand.vmem [shape: f32[128,128], index: 0, kind: input, shape index: {}]   ;;  %s306_s1 = inlined_call_operand.vmem [shape: f32[1,128], index: 1, kind: input, shape index: {}]   ;;  %s307_s2 = inlined_call_operand.vmem [shape: f32[1,128], index: 2, kind: input, shape index: {}]   ;;  %s308_s3 = inlined_call_operand.vmem [shape: f32[128,128], index: 3, kind: output, shape index: {}]  }
   0x1   :  { %v14_v0 = vld [vmem:[%s305_s0] sm:$0xff]  ;;  %v15_v4 = vld [vmem:[%s305_s0 + $0x8] sm:$0xff]  ;;  %v16_v5 = vld [vmem:[%s305_s0 + $0x10] sm:$0xff] }
   0x2   :  { %v172_v1 = vld [vmem:[%s306_s1] ss:$0 sm:$0xff]  ;;  %v17_v6 = vld [vmem:[%s305_s0 + $0x18] sm:$0xff]  ;;  %v19_v11 = vld [vmem:[%s305_s0 + $0x28] sm:$0xff] }
   0x3   :  { %v177_v2 = vld [vmem:[%s307_s2] ss:$0 sm:$0xff]  ;;  %v37_v3 = vmul.f32 %v172_v1, %v14_v0  ;;  %v38_v7 = vmul.f32 %v172_v1, %v15_v4  ;;  %v39_v8 = vmul.f32 %v172_v1, %v16_v5  ;;  %v40_v9 = vmul.f32 %v172_v1, %v17_v6  ;;  %v20_v12 = vld [vmem:[%s305_s0 + $0x30] sm:$0xff]  ;;  %v21_v17 = vld [vmem:[%s305_s0 + $0x38] sm:$0xff] }
   0x4   :  { %v18_v10 = vld [vmem:[%s305_s0 + $0x20] sm:$0xff]  ;;  %v42_v15 = vmul.f32 %v172_v1, %v19_v11  ;;  %v43_v16 = vmul.f32 %v172_v1, %v20_v12  ;;  %v44_v21 = vmul.f32 %v172_v1, %v21_v17  ;;  %v23_v30 = vld [vmem:[%s305_s0 + $0x48] sm:$0xff]  ;;  %v24_v31 = vld [vmem:[%s305_s0 + $0x50] sm:$0xff] }
   0x5   :  { %v60_v13 = vadd.f32 %v177_v2, %v37_v3  ;;  %v41_v14 = vmul.f32 %v172_v1, %v18_v10  ;;  %v61_v18 = vadd.f32 %v177_v2, %v38_v7  ;;  %v62_v19 = vadd.f32 %v177_v2, %v39_v8  ;;  %v22_v25 = vld [vmem:[%s305_s0 + $0x40] sm:$0xff]  ;;  %v25_v43 = vld [vmem:[%s305_s0 + $0x58] sm:$0xff]  ;;  %v27_v45 = vld [vmem:[%s305_s0 + $0x68] sm:$0xff] }
   0x6   :  { %v63_v20 = vadd.f32 %v177_v2, %v40_v9  ;;  %v65_v24 = vadd.f32 %v177_v2, %v42_v15  ;;  %v66_v37 = vadd.f32 %v177_v2, %v43_v16  ;;  %v67_v38 = vadd.f32 %v177_v2, %v44_v21  ;;  %v26_v44 = vld [vmem:[%s305_s0 + $0x60] sm:$0xff]  ;;  %v28_v56 = vld [vmem:[%s305_s0 + $0x70] sm:$0xff]  ;;  %v29_v4 = vld [vmem:[%s305_s0 + $0x78] sm:$0xff] }
   0x7   :  { %vm76_vm0 = vcmp.gt.f32.partialorder %v60_v13, 0.0  ;;  %v92_v22 = vmul.f32 0.2, %v60_v13  ;;  %v64_v23 = vadd.f32 %v177_v2, %v41_v14  ;;  %vm77_vm1 = vcmp.gt.f32.partialorder %v61_v18, 0.0 }
   0x8   :  { %v93_v26 = vmul.f32 0.2, %v61_v18  ;;  %vm78_vm2 = vcmp.gt.f32.partialorder %v62_v19, 0.0  ;;  %v94_v27 = vmul.f32 0.2, %v62_v19  ;;  %vm79_vm3 = vcmp.gt.f32.partialorder %v63_v20, 0.0 }
   0x9   :  { %v108_v28 = vsel %vm76_vm0, %v60_v13, %v92_v22  ;;  %v95_v29 = vmul.f32 0.2, %v63_v20  ;;  %vm80_vm4 = vcmp.gt.f32.partialorder %v64_v23, 0.0  ;;  %v96_v34 = vmul.f32 0.2, %v64_v23 }
   0xa   :  { %124 = vst [vmem:[%s308_s3] sm:$0xff] %v108_v28  ;;  %v109_v32 = vsel %vm77_vm1, %v61_v18, %v93_v26  ;;  %v110_v33 = vsel %vm78_vm2, %v62_v19, %v94_v27  ;;  %vm81_vm5 = vcmp.gt.f32.partialorder %v65_v24, 0.0  ;;  %v97_v36 = vmul.f32 0.2, %v65_v24 }
   0xb   :  { %125 = vst [vmem:[%s308_s3 + $0x8] sm:$0xff] %v109_v32  ;;  %126 = vst [vmem:[%s308_s3 + $0x10] sm:$0xff] %v110_v33  ;;  %v111_v35 = vsel %vm79_vm3, %v63_v20, %v95_v29  ;;  %v112_v39 = vsel %vm80_vm4, %v64_v23, %v96_v34  ;;  %v45_v40 = vmul.f32 %v172_v1, %v22_v25  ;;  %vm82_vm6 = vcmp.gt.f32.partialorder %v66_v37, 0.0 }
   0xc   :  { %127 = vst [vmem:[%s308_s3 + $0x18] sm:$0xff] %v111_v35  ;;  %v46_v41 = vmul.f32 %v172_v1, %v23_v30  ;;  %v47_v42 = vmul.f32 %v172_v1, %v24_v31  ;;  %128 = vst [vmem:[%s308_s3 + $0x20] sm:$0xff] %v112_v39  ;;  %v113_v46 = vsel %vm81_vm5, %v65_v24, %v97_v36  ;;  %v98_v47 = vmul.f32 0.2, %v66_v37 }
   0xd   :  { %vm83_vm7 = vcmp.gt.f32.partialorder %v67_v38, 0.0  ;;  %129 = vst [vmem:[%s308_s3 + $0x28] sm:$0xff] %v113_v46  ;;  %v99_v48 = vmul.f32 0.2, %v67_v38  ;;  %v68_v49 = vadd.f32 %v177_v2, %v45_v40  ;;  %v48_v53 = vmul.f32 %v172_v1, %v25_v43 }
   0xe   :  { %v69_v50 = vadd.f32 %v177_v2, %v46_v41  ;;  %v70_v51 = vadd.f32 %v177_v2, %v47_v42  ;;  %v114_v52 = vsel %vm82_vm6, %v66_v37, %v98_v47  ;;  %v49_v54 = vmul.f32 %v172_v1, %v26_v44 }
   0xf   :  { %v50_v55 = vmul.f32 %v172_v1, %v27_v45  ;;  %130 = vst [vmem:[%s308_s3 + $0x30] sm:$0xff] %v114_v52  ;;  %v115_v57 = vsel %vm83_vm7, %v67_v38, %v99_v48  ;;  %vm84_vm8 = vcmp.gt.f32.partialorder %v68_v49, 0.0  ;;  %v100_v58 = vmul.f32 0.2, %v68_v49 }
  0x10   :  { %vm85_vm9 = vcmp.gt.f32.partialorder %v69_v50, 0.0  ;;  %131 = vst [vmem:[%s308_s3 + $0x38] sm:$0xff] %v115_v57  ;;  %v101_v59 = vmul.f32 0.2, %v69_v50  ;;  %vm86_vm10 = vcmp.gt.f32.partialorder %v70_v51, 0.0  ;;  %v71_v61 = vadd.f32 %v177_v2, %v48_v53 }
  0x11   :  { %v102_v60 = vmul.f32 0.2, %v70_v51  ;;  %v116_v62 = vsel %vm84_vm8, %v68_v49, %v100_v58  ;;  %v72_v63 = vadd.f32 %v177_v2, %v49_v54  ;;  %v73_v0 = vadd.f32 %v177_v2, %v50_v55 }
  0x12   :  { %v51_v3 = vmul.f32 %v172_v1, %v28_v56  ;;  %132 = vst [vmem:[%s308_s3 + $0x40] sm:$0xff] %v116_v62  ;;  %v117_v5 = vsel %vm85_vm9, %v69_v50, %v101_v59  ;;  %vm87_vm11 = vcmp.gt.f32.partialorder %v71_v61, 0.0  ;;  %v103_v7 = vmul.f32 0.2, %v71_v61 }
  0x13   :  { %v118_v6 = vsel %vm86_vm10, %v70_v51, %v102_v60  ;;  %133 = vst [vmem:[%s308_s3 + $0x48] sm:$0xff] %v117_v5  ;;  %vm88_vm12 = vcmp.gt.f32.partialorder %v72_v63, 0.0  ;;  %v104_v8 = vmul.f32 0.2, %v72_v63  ;;  %vm89_vm13 = vcmp.gt.f32.partialorder %v73_v0, 0.0 }
  0x14   :  { %134 = vst [vmem:[%s308_s3 + $0x50] sm:$0xff] %v118_v6  ;;  %v105_v9 = vmul.f32 0.2, %v73_v0  ;;  %v119_v10 = vsel %vm87_vm11, %v71_v61, %v103_v7  ;;  %v74_v11 = vadd.f32 %v177_v2, %v51_v3  ;;  %v52_v12 = vmul.f32 %v172_v1, %v29_v4 }
  0x15   :  { %135 = vst [vmem:[%s308_s3 + $0x58] sm:$0xff] %v119_v10  ;;  %v120_v13 = vsel %vm88_vm12, %v72_v63, %v104_v8 }
  0x16   :  { %v121_v14 = vsel %vm89_vm13, %v73_v0, %v105_v9  ;;  %136 = vst [vmem:[%s308_s3 + $0x60] sm:$0xff] %v120_v13  ;;  %vm90_vm14 = vcmp.gt.f32.partialorder %v74_v11, 0.0  ;;  %v106_v15 = vmul.f32 0.2, %v74_v11  ;;  %v75_v16 = vadd.f32 %v177_v2, %v52_v12 }
  0x17   :  { %137 = vst [vmem:[%s308_s3 + $0x68] sm:$0xff] %v121_v14 }
  0x18   :  { %v122_v17 = vsel %vm90_vm14, %v74_v11, %v106_v15  ;;  %vm91_vm15 = vcmp.gt.f32.partialorder %v75_v16, 0.0  ;;  %v107_v1 = vmul.f32 0.2, %v75_v16 }
  0x19   :  { %138 = vst [vmem:[%s308_s3 + $0x70] sm:$0xff] %v122_v17 }
  0x1a   :  { %v123_v18 = vsel %vm91_vm15, %v75_v16, %v107_v1 }
  0x1b   :  { %139 = vst [vmem:[%s308_s3 + $0x78] sm:$0xff] %v123_v18 }

// kernel: _lambda_.10
= control target key start
LH: loop header
LB: loop body
LE: loop exit
PB: predicated region body
PF: predicated region fallthrough
CT: control target
= control target key end

     0   :  { %s112_s0 = inlined_call_operand.vmem [shape: f32[32,128], index: 0, kind: input, shape index: {}]   ;;  %s113_s1 = inlined_call_operand.vmem [shape: f32[1,128], index: 1, kind: input, shape index: {}]   ;;  %s114_s2 = inlined_call_operand.vmem [shape: f32[1,128], index: 2, kind: input, shape index: {}]   ;;  %s115_s3 = inlined_call_operand.vmem [shape: f32[32,128], index: 3, kind: output, shape index: {}]  }
   0x1   :  { %v14_v0 = vld [vmem:[%s112_s0] sm:$0xff]  ;;  %v15_v4 = vld [vmem:[%s112_s0 + $0x8] sm:$0xff]  ;;  %v16_v5 = vld [vmem:[%s112_s0 + $0x10] sm:$0xff] }
   0x2   :  { %v60_v1 = vld [vmem:[%s113_s1] ss:$0 sm:$0xff]  ;;  %v17_v6 = vld [vmem:[%s112_s0 + $0x18] sm:$0xff] }
   0x3   :  { %v61_v2 = vld [vmem:[%s114_s2] ss:$0 sm:$0xff]  ;;  %v25_v3 = vmul.f32 %v60_v1, %v14_v0  ;;  %v26_v7 = vmul.f32 %v60_v1, %v15_v4  ;;  %v27_v8 = vmul.f32 %v60_v1, %v16_v5  ;;  %v28_v9 = vmul.f32 %v60_v1, %v17_v6 }
   0x5   :  { %v36_v10 = vadd.f32 %v61_v2, %v25_v3  ;;  %v37_v11 = vadd.f32 %v61_v2, %v26_v7  ;;  %v38_v12 = vadd.f32 %v61_v2, %v27_v8  ;;  %v39_v13 = vadd.f32 %v61_v2, %v28_v9 }
   0x7   :  { %vm40_vm0 = vcmp.gt.f32.partialorder %v36_v10, 0.0  ;;  %v44_v14 = vmul.f32 0.2, %v36_v10  ;;  %vm41_vm1 = vcmp.gt.f32.partialorder %v37_v11, 0.0  ;;  %v45_v15 = vmul.f32 0.2, %v37_v11 }
   0x8   :  { %vm42_vm2 = vcmp.gt.f32.partialorder %v38_v12, 0.0  ;;  %v46_v16 = vmul.f32 0.2, %v38_v12  ;;  %vm43_vm3 = vcmp.gt.f32.partialorder %v39_v13, 0.0  ;;  %v47_v18 = vmul.f32 0.2, %v39_v13 }
   0x9   :  { %v48_v17 = vsel %vm40_vm0, %v36_v10, %v44_v14  ;;  %v49_v19 = vsel %vm41_vm1, %v37_v11, %v45_v15 }
   0xa   :  { %52 = vst [vmem:[%s115_s3] sm:$0xff] %v48_v17  ;;  %v50_v20 = vsel %vm42_vm2, %v38_v12, %v46_v16  ;;  %53 = vst [vmem:[%s115_s3 + $0x8] sm:$0xff] %v49_v19  ;;  %v51_v21 = vsel %vm43_vm3, %v39_v13, %v47_v18 }
   0xb   :  { %54 = vst [vmem:[%s115_s3 + $0x10] sm:$0xff] %v50_v20  ;;  %55 = vst [vmem:[%s115_s3 + $0x18] sm:$0xff] %v51_v21 }

// kernel: _lambda_.9
= control target key start
LH: loop header
LB: loop body
LE: loop exit
PB: predicated region body
PF: predicated region fallthrough
CT: control target
= control target key end

     0   :  { %vm169_vm0 = vcmask 1040384   ;;  %s295_s1 = inlined_call_operand.vmem [shape: bf16[128,128], index: 1, kind: input, shape index: {}]   ;;  %s296_s0 = inlined_call_operand.vmem [shape: bf16[32,128], index: 0, kind: input, shape index: {}]   ;;  %s297_s2 = inlined_call_operand.vmem [shape: f32[32,128], index: 2, kind: output, shape index: {0}]   ;;  %s298_s3 = inlined_call_operand.vmem [shape: f32[1,2,128], index: 3, kind: output, shape index: {1}]  }
   0x1   :  { %v220_v0 = vld [vmem:[%s295_s1] sm:$0xff]   ;;  %v221_v1 = vld [vmem:[%s295_s1 + $0x8] sm:$0xff]   ;;  %v222_v2 = vld [vmem:[%s295_s1 + $0x10] sm:$0xff]  }
   0x2   :  { %200 = vmatprep.subr.bf16.mxu0 %v220_v0  ;;  %v223_v3 = vld [vmem:[%s295_s1 + $0x18] sm:$0xff]   ;;  %v228_v4 = vld [vmem:[%s296_s0] sm:$0xff]   ;;  %v225_v6 = vld [vmem:[%s295_s1 + $0x28] sm:$0xff]  }
   0x3   :  { %201 = vmatpush3.bf16.msra.mxu0 %v220_v0  ;;  %216 = vmatprep.mubr.bf16.mxu0 %v228_v4  ;;  %v224_v5 = vld [vmem:[%s295_s1 + $0x20] sm:$0xff]   ;;  %v226_v7 = vld [vmem:[%s295_s1 + $0x30] sm:$0xff]   ;;  %v227_v8 = vld [vmem:[%s295_s1 + $0x38] sm:$0xff]  }
   0x4   :  { %202 = vmatprep.subr.bf16.mxu0 %v221_v1  ;;  %v229_v9 = vld [vmem:[%s296_s0 + $0x8] sm:$0xff]  }
   0x7   :  { %203 = vmatpush3.bf16.msra.mxu0 %v221_v1 }
   0x8   :  { %204 = vmatprep.subr.bf16.mxu0 %v222_v2 }
   0xb   :  { %205 = vmatpush3.bf16.msra.mxu0 %v222_v2 }
   0xc   :  { %206 = vmatprep.subr.bf16.mxu0 %v223_v3 }
   0xf   :  { %207 = vmatpush3.bf16.msra.mxu0 %v223_v3 }
  0x10   :  { %208 = vmatprep.subr.bf16.mxu0 %v224_v5 }
  0x13   :  { %209 = vmatpush3.bf16.msra.mxu0 %v224_v5 }
  0x14   :  { %210 = vmatprep.subr.bf16.mxu0 %v225_v6 }
  0x17   :  { %211 = vmatpush3.bf16.msra.mxu0 %v225_v6 }
  0x18   :  { %212 = vmatprep.subr.bf16.mxu0 %v226_v7 }
  0x1b   :  { %213 = vmatpush3.bf16.msra.mxu0 %v226_v7 }
  0x1c   :  { %214 = vmatprep.subr.bf16.mxu0 %v227_v8 }
  0x1f   :  { %215 = vmatpush3.bf16.msra.mxu0 %v227_v8 }
  0x22   :  { %217 = vmatmul.mubr.bf16.vlgmr.msra.gmra.mrb[0].mxu0 %v229_v9 }
  0xf5   :  { %v218_v10 = vpop.f32.mrb[0].mxu0 }
  0xf6   :  { %145 = vst [vmem:[%s297_s2 + $0x10] sm:$0xff] %v218_v10  ;;  %v128_v11 = vpop.f32.mrb[1].mxu0  ;;  %v158_v17 = vmul.f32 %v218_v10, %v218_v10 }
  0xf7   :  { %143 = vst [vmem:[%s297_s2] sm:$0xff] %v128_v11  ;;  %v219_v12 = vpop.f32.mrb[2].mxu0  ;;  %v156_v14 = vmul.f32 %v128_v11, %v128_v11 }
  0xf8   :  { %146 = vst [vmem:[%s297_s2 + $0x18] sm:$0xff] %v219_v12  ;;  %v131_v13 = vpop.f32.mrb[3].mxu0  ;;  %v159_v20 = vmul.f32 %v219_v12, %v219_v12 }
  0xf9   :  { %144 = vst [vmem:[%s297_s2 + $0x8] sm:$0xff] %v131_v13  ;;  %v147_v15 = vadd.f32 %v131_v13, %v128_v11  ;;  %v157_v16 = vmul.f32 %v131_v13, %v131_v13 }
  0xfb   :  { %v148_v18 = vadd.f32 %v218_v10, %v147_v15  ;;  %v160_v19 = vadd.f32 %v157_v16, %v156_v14 }
  0xfd   :  { %v149_v21 = vadd.f32 %v219_v12, %v148_v18  ;;  %v161_v22 = vadd.f32 %v160_v19, %v158_v17 }
  0xff   :  { %v150_v23 = vrot.slane %v149_v21, 4  ;;  %v162_v24 = vadd.f32 %v161_v22, %v159_v20 }
 0x101   :  { %v151_v25 = vadd.f32 %v150_v23, %v149_v21  ;;  %v163_v26 = vrot.slane %v162_v24, 4 }
 0x103   :  { %v152_v27 = vrot.slane %v151_v25, 2  ;;  %v164_v28 = vadd.f32 %v163_v26, %v162_v24 }
 0x105   :  { %v153_v29 = vadd.f32 %v152_v27, %v151_v25  ;;  %v165_v30 = vrot.slane %v164_v28, 2 }
 0x107   :  { %v154_v31 = vrot.slane %v153_v29, 1  ;;  %v166_v32 = vadd.f32 %v165_v30, %v164_v28 }
 0x109   :  { %v167_v33 = vrot.slane %v166_v32, 1  ;;  %v155_v34 = vadd.f32 %v154_v31, %v153_v29 }
 0x10b   :  { %v168_v35 = vadd.f32 %v167_v33, %v166_v32 }
 0x10d   :  { %v170_v36 = vsel %vm169_vm0, %v155_v34, %v168_v35 }
 0x10e   :  { %171 = vst [vmem:[%s298_s3] sm:$0x3] %v170_v36 }

// kernel: _lambda_.11
= control target key start
LH: loop header
LB: loop body
LE: loop exit
PB: predicated region body
PF: predicated region fallthrough
CT: control target
= control target key end

     0   :  { %s320_s1 = inlined_call_operand.vmem [shape: bf16[256,128], index: 1, kind: input, shape index: {}]   ;;  %s321_s0 = inlined_call_operand.vmem [shape: bf16[8,256], index: 0, kind: input, shape index: {}]   ;;  %s322_s2 = inlined_call_operand.vmem [shape: f32[8,128], index: 2, kind: output, shape index: {}]  }
   0x1   :  { %v233_v0 = vld [vmem:[%s320_s1 + $0x40] sm:$0xff]   ;;  %v235_v2 = vld [vmem:[%s320_s1 + $0x48] sm:$0xff]   ;;  %v237_v4 = vld [vmem:[%s320_s1 + $0x50] sm:$0xff]  }
   0x2   :  { %v234_v1 = vld [vmem:[%s320_s1] sm:$0xff]   ;;  %211 = vmatprep.subr.bf16.mxu0 %v233_v0  ;;  %v236_v3 = vld [vmem:[%s320_s1 + $0x8] sm:$0xff]   ;;  %v238_v5 = vld [vmem:[%s320_s1 + $0x10] sm:$0xff]  }
   0x3   :  { %212 = vmatpush3.bf16.msra.mxu0 %v234_v1  ;;  %v239_v6 = vld [vmem:[%s320_s1 + $0x58] sm:$0xff]   ;;  %v241_v8 = vld [vmem:[%s320_s1 + $0x60] sm:$0xff]   ;;  %v243_v10 = vld [vmem:[%s320_s1 + $0x68] sm:$0xff]  }
   0x4   :  { %213 = vmatprep.subr.bf16.mxu0 %v235_v2  ;;  %v240_v7 = vld [vmem:[%s320_s1 + $0x18] sm:$0xff]   ;;  %v242_v9 = vld [vmem:[%s320_s1 + $0x20] sm:$0xff]   ;;  %v244_v13 = vld [vmem:[%s320_s1 + $0x28] sm:$0xff]  }
   0x5   :  { %v12_v11 = vld [vmem:[%s321_s0] sm:$0xff]  ;;  %v245_v14 = vld [vmem:[%s320_s1 + $0x70] sm:$0xff]   ;;  %v247_v16 = vld [vmem:[%s320_s1 + $0x78] sm:$0xff]  }
   0x6   :  { %v194_v12 = vcombine.high %v12_v11, %v12_v11  ;;  %v246_v15 = vld [vmem:[%s320_s1 + $0x30] sm:$0xff]   ;;  %v248_v17 = vld [vmem:[%s320_s1 + $0x38] sm:$0xff]   ;;  %v193_v18 = vcombine.low %v12_v11, %v12_v11 }
   0x7   :  { %214 = vmatpush3.bf16.msra.mxu0 %v236_v3 }
   0x8   :  { %215 = vmatprep.subr.bf16.mxu0 %v237_v4  ;;  %180 = vmatprep.mubr.bf16.mxu0 %v194_v12 }
   0xb   :  { %216 = vmatpush3.bf16.msra.mxu0 %v238_v5 }
   0xc   :  { %217 = vmatprep.subr.bf16.mxu0 %v239_v6 }
   0xf   :  { %218 = vmatpush3.bf16.msra.mxu0 %v240_v7 }
  0x10   :  { %219 = vmatprep.subr.bf16.mxu0 %v241_v8 }
  0x13   :  { %220 = vmatpush3.bf16.msra.mxu0 %v242_v9 }
  0x14   :  { %221 = vmatprep.subr.bf16.mxu0 %v243_v10 }
  0x17   :  { %222 = vmatpush3.bf16.msra.mxu0 %v244_v13 }
  0x18   :  { %223 = vmatprep.subr.bf16.mxu0 %v245_v14 }
  0x1b   :  { %224 = vmatpush3.bf16.msra.mxu0 %v246_v15 }
  0x1c   :  { %225 = vmatprep.subr.bf16.mxu0 %v247_v16 }
  0x1f   :  { %226 = vmatpush3.bf16.msra.mxu0 %v248_v17 }
  0x22   :  { %181 = vmatmul.mubr.bf16.vlgmr.msra.gmra.mrb[0].mxu0 %v193_v18 }
  0xf5   :  { %v227_v19 = vpop.f32.mrb[0].mxu0 }
  0xf6   :  { %v228_v20 = vpop.f32.mrb[1].mxu0 }
  0xf7   :  { %v229_v21 = vadd.f32 %v228_v20, %v227_v19  ;;  %v230_v22 = vpop.f32.mrb[2].mxu0 }
  0xf8   :  { %v231_v23 = vpop.f32.mrb[3].mxu0 }
  0xf9   :  { %188 = vst [vmem:[%s322_s2] sm:$0xff] %v229_v21 }

</bundles_post_ra>
